<compile_context>
chip_gen: v7x
topology: tpu7x:2x2x1
jax: 0.10.0
libtpu: 0.0.40
codegen_flags: <defaults>
</compile_context>

<pallas_src>
import jax
import jax.numpy as jnp
from jax.experimental import pallas as pl
from jax.experimental.pallas import tpu as pltpu


def _nan_l1_kernel(pred_ref, true_ref, means_ref, mask_ref, sum_ref, cnt_ref):
    """One (batch-tile, dim-tile) block.

    Accumulates, per dim:
      mask    = ~isnan(y_true)
      sum_ref += sum_b |y_pred * mask - where(mask, y_true, 0)|
      cnt_ref += sum_b mask
    On the last batch step:
      dim_means = sum_ref / max(cnt_ref, 1)
    """
    bi = pl.program_id(1)

    @pl.when(bi == 0)
    def _():
        sum_ref[...] = jnp.zeros_like(sum_ref)
        cnt_ref[...] = jnp.zeros_like(cnt_ref)

    pred = pred_ref[...].astype(jnp.float32)          # [bt, td]
    true = true_ref[...].astype(jnp.float32)          # [bt, td]

    mask = jnp.logical_not(jnp.isnan(true))           # [bt, td] bool
    maskf = mask.astype(jnp.float32)

    # Keep `pred * maskf` (not a where) so that NaNs present in y_pred at
    # masked-out positions propagate into the loss, exactly like the PyTorch
    # reference (y_pred_masked = y_pred * mask.float()).
    pred_masked = pred * maskf
    true_masked = jnp.where(mask, true, 0.0)
    abs_err = jnp.abs(pred_masked - true_masked)       # [bt, td]

    sum_ref[...] += jnp.sum(abs_err, axis=0, keepdims=True)   # [1, td]
    cnt_ref[...] += jnp.sum(maskf, axis=0, keepdims=True)     # [1, td]

    # int8 mask: 1 byte/elem of HBM write instead of 4.
    mask_ref[...] = mask.astype(jnp.int8)

    @pl.when(bi == pl.num_programs(1) - 1)
    def _():
        n_valid = jnp.maximum(cnt_ref[...], 1.0)       # clamp(min=1)
        means_ref[...] = (sum_ref[...] / n_valid).astype(means_ref.dtype)


def _pick_tile(total, tile, align):
    """Largest divisor of `total` that is <= tile and a multiple of `align`,
    or `total` itself (full axis) if none exists / total already fits."""
    if total <= tile:
        return total
    t = (tile // align) * align
    while t >= align:
        if total % t == 0:
            return t
        t -= align
    return total


def multi_dim_nan_tolerant_l1_loss(y_pred, y_true, *, dim_tile=512,
                                   batch_tile=1024):
    """Pallas equivalent of MultiDimNaNTolerantL1Loss.forward.

    Returns:
      dim_means: float32 [num_dims]
      mask:      bool    [batch, num_dims]
    """
    assert y_pred.shape == y_true.shape, (
        "Predictions and targets must have the same shape")
    B, D = y_pred.shape

    # Dim tile: lane-aligned (multiple of 128) unless D itself is smaller.
    td = _pick_tile(D, dim_tile, 128)
    # v7x megacore: keep >= 2 steps on the "parallel" dims axis when possible
    # so the grid can shard across both TensorCores.
    if (D // td) < 2 and td % 256 == 0:
        td //= 2

    # Batch tile: multiple of 32 (int8 sublane tile) unless B itself is used
    # as a single full block.
    bt = _pick_tile(B, batch_tile, 32)
    # TODO(synk): for very large B with no 32-aligned divisor this falls back
    # to a single full-batch block (correct, but VMEM-heavy).

    grid = (D // td, B // bt)

    # Double-buffered VMEM footprint: 2 inputs + int8 mask output (x2 buffers)
    # + small means/scratch.  Raise the scoped-VMEM limit (matters on v5e's
    # 16 MiB default) while staying well under v7x's 64 MiB physical VMEM.
    itemsize = jnp.dtype(y_pred.dtype).itemsize
    vmem_bytes = (2 * 2 * bt * td * itemsize      # two inputs, double buffered
                  + 2 * bt * td * 1               # int8 mask out, double buffered
                  + 2 * td * 4                    # means out
                  + 2 * 8 * td * 4)               # f32 scratch (sublane padded)
    vmem_limit = int(min(max(32 * 1024 * 1024, 2 * vmem_bytes),
                         60 * 1024 * 1024))

    means, mask_i8 = pl.pallas_call(
        _nan_l1_kernel,
        out_shape=(jax.ShapeDtypeStruct((1, D), jnp.float32),
                   jax.ShapeDtypeStruct((B, D), jnp.int8)),
        grid_spec=pltpu.PrefetchScalarGridSpec(
            num_scalar_prefetch=0,
            grid=grid,
            in_specs=[pl.BlockSpec((bt, td), lambda j, bi: (bi, j)),
                      pl.BlockSpec((bt, td), lambda j, bi: (bi, j))],
            out_specs=(pl.BlockSpec((1, td), lambda j, bi: (0, j)),
                       pl.BlockSpec((bt, td), lambda j, bi: (bi, j))),
            scratch_shapes=[pltpu.VMEM((1, td), jnp.float32),
                            pltpu.VMEM((1, td), jnp.float32)],
        ),
        compiler_params=pltpu.CompilerParams(
            dimension_semantics=("parallel", "arbitrary"),
            vmem_limit_bytes=vmem_limit),
    )(y_pred, y_true)

    dim_means = means.reshape(D)
    mask = mask_i8.astype(jnp.bool_)   # 1-byte -> bool, cheap pass
    return dim_means, mask


def _reference(y_pred, y_true):
    """Pure-JAX reference mirroring the PyTorch forward."""
    mask = ~jnp.isnan(y_true)
    n_valid = jnp.maximum(jnp.sum(mask, axis=0), 1)
    y_pred_masked = y_pred * mask.astype(y_pred.dtype)
    y_true_masked = jnp.where(mask, y_true, jnp.zeros_like(y_true))
    abs_err = jnp.abs(y_pred_masked - y_true_masked)
    dim_losses = jnp.sum(abs_err, axis=0)
    return dim_losses / n_valid, mask


def _run_case(key, batch, num_dims, **tile_kwargs):
    k1, k2, k3 = jax.random.split(key, 3)
    y_pred = jax.random.normal(k1, (batch, num_dims), dtype=jnp.float32)
    y_true = jax.random.normal(k2, (batch, num_dims), dtype=jnp.float32)
    # Inject NaNs into ~30% of the targets, plus one all-NaN column to
    # exercise the clamp(min=1) path.
    nan_mask = jax.random.bernoulli(k3, p=0.3, shape=(batch, num_dims))
    nan_mask = nan_mask.at[:, 5].set(True)
    y_true = jnp.where(nan_mask, jnp.float32(jnp.nan), y_true)

    dim_means, mask = multi_dim_nan_tolerant_l1_loss(y_pred, y_true,
                                                     **tile_kwargs)
    jax.block_until_ready((dim_means, mask))

    ref_means, ref_mask = _reference(y_pred, y_true)
    assert dim_means.shape == (num_dims,)
    assert mask.shape == (batch, num_dims) and mask.dtype == jnp.bool_
    assert bool(jnp.all(mask == ref_mask))
    assert bool(jnp.allclose(dim_means, ref_means, atol=1e-6, rtol=1e-6))


if __name__ == "__main__":
    key = jax.random.PRNGKey(0)
    ka, kb = jax.random.split(key, 2)

    # Small base case: single grid step.
    _run_case(ka, batch=8, num_dims=128)
    # Tiled case: exercises the (dims x batch) grid and the batch-axis
    # accumulator path (grid = (2, 2) with these tile sizes).
    _run_case(kb, batch=64, num_dims=256, dim_tile=128, batch_tile=32)

    print("KERNEL_OK")
</pallas_src>

<mosaic_0001>
module attributes {stable_mosaic.version = 11 : i64} {
  func.func @_nan_l1_kernel(%arg0: i32, %arg1: i32, %arg2: memref<8x128xf32, #tpu.memory_space<vmem>>, %arg3: memref<8x128xf32, #tpu.memory_space<vmem>>, %arg4: memref<1x128xf32, #tpu.memory_space<vmem>>, %arg5: memref<8x128xi8, #tpu.memory_space<vmem>>, %arg6: memref<1x128xf32, #tpu.memory_space<vmem>>, %arg7: memref<1x128xf32, #tpu.memory_space<vmem>>) attributes {dimension_semantics = [#tpu.dimension_semantics<parallel>, #tpu.dimension_semantics<arbitrary>], iteration_bounds = array<i64: 1, 1>, scalar_prefetch = 0 : i64, scratch_operands = 2 : i64, tpu.core_type = #tpu.core_type<tc>, window_params = [{transform_indices = @transform_0, window_bounds = array<i64: 8, 128>}, {transform_indices = @transform_1, window_bounds = array<i64: 8, 128>}, {transform_indices = @transform_2, window_bounds = array<i64: 1, 128>}, {transform_indices = @transform_3, window_bounds = array<i64: 8, 128>}]} {
    %c0_i32 = arith.constant 0 : i32
    %0 = arith.cmpi eq, %arg1, %c0_i32 : i32
    %1 = arith.extui %0 : i1 to i32
    %c0_i32_0 = arith.constant 0 : i32
    %2 = arith.cmpi ne, %1, %c0_i32_0 : i32
    scf.if %2 {
      %cst_19 = arith.constant 0.000000e+00 : f32
      %29 = vector.broadcast %cst_19 : f32 to vector<1x128xf32>
      %c0_20 = arith.constant 0 : index
      %c0_21 = arith.constant 0 : index
      %30 = vector.load %arg6[%c0_20, %c0_21] : memref<1x128xf32, #tpu.memory_space<vmem>>, vector<1x128xf32>
      tpu.vector_store %arg6[%c0_20, %c0_21], %29 {strides = array<i32>} : memref<1x128xf32, #tpu.memory_space<vmem>>, vector<1x128xf32>,
      %cst_22 = arith.constant 0.000000e+00 : f32
      %31 = vector.broadcast %cst_22 : f32 to vector<1x128xf32>
      %c0_23 = arith.constant 0 : index
      %c0_24 = arith.constant 0 : index
      %32 = vector.load %arg7[%c0_23, %c0_24] : memref<1x128xf32, #tpu.memory_space<vmem>>, vector<1x128xf32>
      tpu.vector_store %arg7[%c0_23, %c0_24], %31 {strides = array<i32>} : memref<1x128xf32, #tpu.memory_space<vmem>>, vector<1x128xf32>,
    } else {
    }
    %c0 = arith.constant 0 : index
    %c0_1 = arith.constant 0 : index
    %3 = vector.load %arg2[%c0, %c0_1] : memref<8x128xf32, #tpu.memory_space<vmem>>, vector<8x128xf32>
    %c0_2 = arith.constant 0 : index
    %c0_3 = arith.constant 0 : index
    %4 = vector.load %arg3[%c0_2, %c0_3] : memref<8x128xf32, #tpu.memory_space<vmem>>, vector<8x128xf32>
    %5 = arith.cmpf one, %4, %4 : vector<8x128xf32>
    %cst = arith.constant dense<true> : vector<8x128xi1>
    %6 = arith.xori %5, %cst : vector<8x128xi1>
    %7 = arith.extui %6 : vector<8x128xi1> to vector<8x128xi32>
    %8 = arith.sitofp %7 : vector<8x128xi32> to vector<8x128xf32>
    %9 = arith.mulf %3, %8 : vector<8x128xf32>
    %cst_4 = arith.constant 0.000000e+00 : f32
    %10 = vector.broadcast %cst_4 : f32 to vector<8x128xf32>
    %11 = arith.select %6, %4, %10 : vector<8x128xi1>, vector<8x128xf32>
    %12 = arith.subf %9, %11 : vector<8x128xf32>
    %13 = math.absf %12 : vector<8x128xf32>
    %c0_5 = arith.constant 0 : index
    %c0_6 = arith.constant 0 : index
    %14 = vector.load %arg6[%c0_5, %c0_6] : memref<1x128xf32, #tpu.memory_space<vmem>>, vector<1x128xf32>
    %cst_7 = arith.constant dense<0.000000e+00> : vector<128xf32>
    %15 = vector.multi_reduction <add>, %13, %cst_7 [0] : vector<8x128xf32> to vector<128xf32>
    %16 = vector.shape_cast %15 : vector<128xf32> to vector<1x128xf32>
    %17 = arith.addf %14, %16 : vector<1x128xf32>
    %c0_8 = arith.constant 0 : index
    %c0_9 = arith.constant 0 : index
    %18 = vector.load %arg6[%c0_8, %c0_9] : memref<1x128xf32, #tpu.memory_space<vmem>>, vector<1x128xf32>
    tpu.vector_store %arg6[%c0_8, %c0_9], %17 {strides = array<i32>} : memref<1x128xf32, #tpu.memory_space<vmem>>, vector<1x128xf32>,
    %c0_10 = arith.constant 0 : index
    %c0_11 = arith.constant 0 : index
    %19 = vector.load %arg7[%c0_10, %c0_11] : memref<1x128xf32, #tpu.memory_space<vmem>>, vector<1x128xf32>
    %cst_12 = arith.constant dense<0.000000e+00> : vector<128xf32>
    %20 = vector.multi_reduction <add>, %8, %cst_12 [0] : vector<8x128xf32> to vector<128xf32>
    %21 = vector.shape_cast %20 : vector<128xf32> to vector<1x128xf32>
    %22 = arith.addf %19, %21 : vector<1x128xf32>
    %c0_13 = arith.constant 0 : index
    %c0_14 = arith.constant 0 : index
    %23 = vector.load %arg7[%c0_13, %c0_14] : memref<1x128xf32, #tpu.memory_space<vmem>>, vector<1x128xf32>
    tpu.vector_store %arg7[%c0_13, %c0_14], %22 {strides = array<i32>} : memref<1x128xf32, #tpu.memory_space<vmem>>, vector<1x128xf32>,
    %24 = arith.extui %6 : vector<8x128xi1> to vector<8x128xi8>
    %c0_15 = arith.constant 0 : index
    %c0_16 = arith.constant 0 : index
    %25 = vector.load %arg5[%c0_15, %c0_16] : memref<8x128xi8, #tpu.memory_space<vmem>>, vector<8x128xi8>
    tpu.vector_store %arg5[%c0_15, %c0_16], %24 {strides = array<i32>} : memref<8x128xi8, #tpu.memory_space<vmem>>, vector<8x128xi8>,
    %c0_i32_17 = arith.constant 0 : i32
    %26 = arith.cmpi eq, %arg1, %c0_i32_17 : i32
    %27 = arith.extui %26 : i1 to i32
    %c0_i32_18 = arith.constant 0 : i32
    %28 = arith.cmpi ne, %27, %c0_i32_18 : i32
    scf.if %28 {
      %c0_19 = arith.constant 0 : index
      %c0_20 = arith.constant 0 : index
      %29 = vector.load %arg7[%c0_19, %c0_20] : memref<1x128xf32, #tpu.memory_space<vmem>>, vector<1x128xf32>
      %cst_21 = arith.constant 1.000000e+00 : f32
      %30 = vector.broadcast %cst_21 : f32 to vector<1x128xf32>
      %31 = arith.maximumf %29, %30 : vector<1x128xf32>
      %c0_22 = arith.constant 0 : index
      %c0_23 = arith.constant 0 : index
      %32 = vector.load %arg6[%c0_22, %c0_23] : memref<1x128xf32, #tpu.memory_space<vmem>>, vector<1x128xf32>
      %33 = arith.divf %32, %31 : vector<1x128xf32>
      %c0_24 = arith.constant 0 : index
      %c0_25 = arith.constant 0 : index
      %34 = vector.load %arg4[%c0_24, %c0_25] : memref<1x128xf32, #tpu.memory_space<vmem>>, vector<1x128xf32>
      tpu.vector_store %arg4[%c0_24, %c0_25], %33 {strides = array<i32>} : memref<1x128xf32, #tpu.memory_space<vmem>>, vector<1x128xf32>,
    } else {
    }
    return
  }
  func.func @transform_0(%arg0: i32, %arg1: i32) -> (i32, i32) {
    %c0_i32 = arith.constant 0 : i32
    return %arg1, %arg0 : i32, i32
  }
  func.func @transform_1(%arg0: i32, %arg1: i32) -> (i32, i32) {
    %c0_i32 = arith.constant 0 : i32
    return %arg1, %arg0 : i32, i32
  }
  func.func @transform_2(%arg0: i32, %arg1: i32) -> (i32, i32) {
    %c0_i32 = arith.constant 0 : i32
    %c0_i32_0 = arith.constant 0 : i32
    return %c0_i32, %arg0 : i32, i32
  }
  func.func @transform_3(%arg0: i32, %arg1: i32) -> (i32, i32) {
    %c0_i32 = arith.constant 0 : i32
    return %arg1, %arg0 : i32, i32
  }
}

</mosaic_0001>

<bundles_post_ra>
// kernel: tpu_custom_call.1
= control target key start
LH: loop header
LB: loop body
LE: loop exit
PB: predicated region body
PF: predicated region fallthrough
CT: control target
= control target key end

     0   :  { %9 = vsyncpa [#allocation5], 0  ;;  %s299_s0 = inlined_call_operand.hbm [shape: f32[8,128], index: 0, kind: input, shape index: {}]   ;;  %s300_s1 = inlined_call_operand.hbm [shape: f32[8,128], index: 1, kind: input, shape index: {}]   ;;  %s301_s2 = inlined_call_operand.hbm [shape: f32[1,128], index: 2, kind: output, shape index: {0}]   ;;  %s302_s3 = inlined_call_operand.hbm [shape: s8[8,128], index: 3, kind: output, shape index: {1}]  }
   0x1   :  { %10 = vsyncpa [#allocation8], 0 }
   0x2   :  { %11 = vsyncpa [#allocation6], 0 }
   0x3   :  { %12 = vsyncpa [#allocation11], 0  ;;  %s224_s12 = smov [#allocation4]   ;;  %s225_s14 = smov [#allocation7]  }
   0x4   :  { %s19_s13 = sshll.u32 %s224_s12, 4  ;;  %s29_s15 = sshll.u32 %s225_s14, 4  ;;  %s20_s13 = int_to_ptr.vmem [resolvable:$true] %s19_s13  ;;  %s30_s15 = int_to_ptr.vmem [resolvable:$true] %s29_s15 }
   0x5   :  { %s128_s18 = scalar_lea.hbm %s299_s0, 128 }
   0x6   :  { %p129_p0 = scmp.ne.s32.totalorder %s299_s0, %s128_s18  ;;  %p132_p1 = scmp.lt.u32.totalorder %s128_s18, %s299_s0 }
   0x8   :  { %p134_p2 = pnand %p132_p1, %p129_p0 }
   0xa   :  { %137 = shalt.err (!%p134_p2)
}
   0xb   :  { %s138_s23 = scalar_lea.vmem %s20_s13, 128  ;;  %p143_p4 = scmp.lt.s32.totalorder %s20_s13, %s20_s13 }
   0xc   :  { %p139_p3 = scmp.ne.s32.totalorder %s20_s13, %s138_s23  ;;  %p144_p5 = scmp.lt.s32.totalorder %s138_s23, %s138_s23 }
   0xe   :  { %p145_p6 = por %p144_p5, %p143_p4 }
  0x10   :  { %p146_p7 = pnand %p145_p6, %p139_p3 }
  0x12   :  { %149 = shalt.err (!%p146_p7)
}
  0x13   :  { %22 = dma.hbm_to_vmem [thread:$0]  %s299_s0, 128, %s20_s13, [#allocation5]  }
  0x14   :  { %s150_s28 = scalar_lea.hbm %s300_s1, 128 }
  0x15   :  { %p151_p8 = scmp.ne.s32.totalorder %s300_s1, %s150_s28  ;;  %p154_p9 = scmp.lt.u32.totalorder %s150_s28, %s300_s1 }
  0x17   :  { %p156_p10 = pnand %p154_p9, %p151_p8 }
  0x19   :  { %159 = shalt.err (!%p156_p10)
}
  0x1a   :  { %s160_s6 = scalar_lea.vmem %s30_s15, 128  ;;  %p165_p12 = scmp.lt.s32.totalorder %s30_s15, %s30_s15 }
  0x1b   :  { %p161_p11 = scmp.ne.s32.totalorder %s30_s15, %s160_s6  ;;  %p166_p13 = scmp.lt.s32.totalorder %s160_s6, %s160_s6 }
  0x1d   :  { %p167_p0 = por %p166_p13, %p165_p12 }
  0x1f   :  { %p168_p1 = pnand %p167_p0, %p161_p11 }
  0x21   :  { %171 = shalt.err (!%p168_p1)
}
  0x22   :  { %32 = dma.hbm_to_vmem [thread:$0]  %s300_s1, 128, %s30_s15, [#allocation8]  }
  0x23   :  { %216 = dma.done.wait [#allocation5], 128  }
  0x24   :  { %217 = vsyncadd [#allocation5], 4294967168 }
  0x25   :  { %218 = dma.done.wait [#allocation8], 128  }
  0x26   :  { %219 = vsyncadd [#allocation8], 4294967168  ;;  %v226_v0 = vmov 0.0   ;;  %v48_v1 = vld [vmem:[#allocation7] sm:$0xff]  ;;  %v47_v2 = vld [vmem:[#allocation4] sm:$0xff]  ;;  %s227_s8 = smov [#allocation10]  }
  0x27   :  { %46 = vst [vmem:[#allocation3] sm:$0x1] %v226_v0  ;;  %45 = vst [vmem:[#allocation2] sm:$0x1] %v226_v0  ;;  %vm49_vm0 = vcmp.ne.f32.partialorder %v48_v1, %v48_v1  ;;  %s104_s9 = sshll.u32 %s227_s8, 4  ;;  %vm228_vm1 = vmmov 1   ;;  %s105_s9 = int_to_ptr.vmem [resolvable:$true] %s104_s9 }
  0x28   :  { %vm50_vm2 = vmxor %vm49_vm0, %vm228_vm1  ;;  %v229_v7 = vmov 0   ;;  %s172_s1 = scalar_lea.vmem %s105_s9, 32  ;;  %p177_p3 = scmp.lt.s32.totalorder %s105_s9, %s105_s9 }
  0x29   :  { %v118_v3 = vsel %vm50_vm2, 1.0, %v226_v0  ;;  %v54_v4 = vsel %vm50_vm2, %v48_v1, 0.0  ;;  %vm75_vm3 = vmpackc.low %vm50_vm2, %vm50_vm2  ;;  %p173_p2 = scmp.ne.s32.totalorder %s105_s9, %s172_s1  ;;  %p178_p4 = scmp.lt.s32.totalorder %s172_s1, %s172_s1 }
  0x2a   :  { %v53_v5 = vmul.f32 %v118_v3, %v47_v2  ;;  %v67_v6 = vrot.slane %v118_v3, 4  ;;  %vm76_vm4 = vmpackc.even %vm75_vm3, %vm75_vm3 }
  0x2b   :  { %v77_v8 = vsel %vm76_vm4, 16843009, %v229_v7  ;;  %p179_p5 = por %p178_p4, %p177_p3 }
  0x2c   :  { %v55_v9 = vsub.f32 %v53_v5, %v54_v4  ;;  %v68_v10 = vadd.f32 %v118_v3, %v67_v6  ;;  %78 = vst [vmem:[#allocation10] sm:$0x3] %v77_v8 }
  0x2d   :  { %p180_p6 = pnand %p179_p5, %p173_p2 }
  0x2f   :  { %183 = shalt.err (!%p180_p6)
}
  0x30   :  { %s184_s12 = scalar_lea.hbm %s302_s3, 32 }
  0x31   :  { %p185_p7 = scmp.ne.s32.totalorder %s302_s3, %s184_s12  ;;  %p188_p8 = scmp.lt.u32.totalorder %s184_s12, %s302_s3 }
  0x33   :  { %p190_p9 = pnand %p188_p8, %p185_p7 }
  0x35   :  { %193 = shalt.err (!%p190_p9)
}
  0x36   :  { %107 = dma.vmem_to_hbm [thread:$0]  %s105_s9, 32, %s302_s3, [#allocation11]   ;;  %v56_v11 = vand.u32 2147483647, %v55_v9  ;;  %v69_v12 = vrot.slane %v68_v10, 2 }
  0x37   :  { %v66_v17 = vld [vmem:[#allocation3] sm:$0x1]  ;;  %v57_v23 = vld [vmem:[#allocation2] sm:$0x1]  ;;  %s230_s3 = smov [#allocation9]  }
  0x38   :  { %v58_v13 = vrot.slane %v56_v11, 4  ;;  %v70_v14 = vadd.f32 %v69_v12, %v68_v10  ;;  %s94_s19 = sshll.u32 %s230_s3, 4  ;;  %s95_s19 = int_to_ptr.vmem [resolvable:$true] %s94_s19 }
  0x39   :  { %s194_s20 = scalar_lea.vmem %s95_s19, 16  ;;  %s198_s21 = scalar_lea.vmem %s95_s19, 32 }
  0x3a   :  { %v71_v15 = vrot.slane %v70_v14, 1  ;;  %v59_v16 = vadd.f32 %v58_v13, %v56_v11  ;;  %p195_p10 = scmp.ne.s32.totalorder %s95_s19, %s194_s20  ;;  %p199_p11 = scmp.lt.s32.totalorder %s95_s19, %s95_s19 }
  0x3b   :  { %p200_p12 = scmp.lt.s32.totalorder %s198_s21, %s194_s20 }
  0x3c   :  { %v72_v18 = vadd.f32 %v71_v15, %v70_v14  ;;  %v60_v19 = vrot.slane %v59_v16, 2 }
  0x3d   :  { %p201_p13 = por %p200_p12, %p199_p11 }
  0x3e   :  { %v73_v20 = vadd.f32 %v72_v18, %v66_v17  ;;  %v61_v21 = vadd.f32 %v60_v19, %v59_v16 }
  0x3f   :  { %p202_p0 = pnand %p201_p13, %p195_p10 }
  0x40   :  { %74 = vst [vmem:[#allocation3] sm:$0x1] %v73_v20  ;;  %v62_v22 = vrot.slane %v61_v21, 1 }
  0x42   :  { %v63_v24 = vadd.f32 %v62_v22, %v61_v21 }
  0x44   :  { %v64_v25 = vadd.f32 %v63_v24, %v57_v23 }
  0x46   :  { %65 = vst [vmem:[#allocation2] sm:$0x1] %v64_v25 }
  0x47   :  { %v82_v26 = vld [vmem:[#allocation3] sm:$0x1] }
  0x48   :  { %v83_v27 = vmax.f32 %v82_v26, 1.0 }
  0x4a   :  { %126 = vrcp.f32 %v83_v27 }
  0x4d   :  { %v84_v28 = vld [vmem:[#allocation2] sm:$0x1] }
  0x54   :  { %v127_v29 = vpop.eup %126 }
  0x55   :  { %v86_v30 = vmul.f32 %v127_v29, %v84_v28 }
  0x57   :  { %87 = vst [vmem:[#allocation9] sm:$0x1] %v86_v30 }
  0x58   :  { %205 = shalt.err (!%p202_p0)
}
  0x59   :  { %s206_s24 = scalar_lea.hbm %s301_s2, 16 }
  0x5a   :  { %p207_p1 = scmp.ne.s32.totalorder %s301_s2, %s206_s24  ;;  %p210_p2 = scmp.lt.u32.totalorder %s206_s24, %s301_s2 }
  0x5c   :  { %p212_p3 = pnand %p210_p2, %p207_p1 }
  0x5e   :  { %215 = shalt.err (!%p212_p3)
}
  0x5f   :  { %97 = dma.vmem_to_hbm [thread:$0]  %s95_s19, 16, %s301_s2, [#allocation6]  }
  0x60   :  { %220 = dma.done.wait [#allocation6], 16  }
  0x61   :  { %221 = vsyncadd [#allocation6], 4294967280 }
  0x62   :  { %222 = dma.done.wait [#allocation11], 32  }
  0x63   :  { %223 = vsyncadd [#allocation11], 4294967264 }
  0x64   :  { %114 = vsyncpa [#allocation5], 1 }
  0x65   :  { %115 = vsyncpa [#allocation8], 1 }
  0x66   :  { %116 = vsyncpa [#allocation6], 1 }
  0x67   :  { %117 = vsyncpa [#allocation11], 1 }

</bundles_post_ra>
